<compile_context>
chip_gen: v5e
topology: v5e:2x2
jax: 0.10.0
libtpu: 0.0.40
codegen_flags: <defaults>
</compile_context>

<pallas_src>
import functools

import jax
import jax.numpy as jnp
from jax.experimental import pallas as pl
from jax.experimental.pallas import tpu as pltpu

_LANE = 128
_SUBLANE = 8

# Mutable flag: flipped off if pipeline_mode=pl.Buffered(1) is rejected.
_BUFFERED_OK = [hasattr(pl, "Buffered")]


def _round_up(n, m):
    return ((n + m - 1) // m) * m


def _vmem_capacity_bytes():
    try:
        return int(pltpu.get_tpu_info().vmem_capacity_bytes)
    except Exception:
        return 64 * 1024 * 1024  # conservative: v7x per-TensorCore VMEM


# ----------------------------- parameter prep ------------------------------

def prepare_mlp_params(params, matmul_dtype=None):
    """One-time prep: zero-pad every feature dim to a multiple of 128 (lane
    width) and cast the weights to the matmul dtype.  Biases stay f32 (bias
    add + LeakyReLU run in f32).  Zero padding is exact: padded input columns
    are 0, padded weight rows/cols are 0, padded bias entries are 0, and
    LeakyReLU(0) == 0, so padded lanes stay 0 through the whole stack."""
    w_dtype = jnp.float32 if matmul_dtype is None else matmul_dtype
    prepared = []
    for p in params:
        fi, fo = p["w"].shape
        pi, po = _round_up(fi, _LANE), _round_up(fo, _LANE)
        wp = jnp.zeros((pi, po), w_dtype).at[:fi, :fo].set(p["w"].astype(w_dtype))
        bp = jnp.zeros((1, po), jnp.float32).at[0, :fo].set(
            p["b"].astype(jnp.float32))
        prepared.append({"w": wp, "b": bp, "in_dim": fi, "out_dim": fo})
    return prepared


# ------------------------------ fused kernel -------------------------------

def _mlp_fused_kernel(x_ref, *refs, num_layers, negative_slope, act_flags,
                      compute_dtype):
    """All layers of one group on one (TILE_B, feat) batch tile; the running
    activation never leaves VMEM/vregs between layers."""
    w_refs = refs[0:2 * num_layers:2]
    b_refs = refs[1:2 * num_layers:2]
    o_ref = refs[2 * num_layers]

    h = x_ref[...].astype(compute_dtype)
    # Static Python loop (layer widths differ).
    for i in range(num_layers):
        # MXU matmul with f32 accumulation regardless of compute dtype.
        y = jnp.dot(h, w_refs[i][...], preferred_element_type=jnp.float32)
        y = y + b_refs[i][...]                     # (1, out_pad) f32 bias
        if act_flags[i]:
            # LeakyReLU(negative_slope); gate y > 0 matches PyTorch.
            y = jnp.where(y > 0.0, y, negative_slope * y)
        # Carry the activation in compute dtype between layers (halves vreg /
        # VMEM pressure for bf16); the final layer keeps f32 until the store.
        h = y if i == num_layers - 1 else y.astype(compute_dtype)
    o_ref[...] = h.astype(o_ref.dtype)


def _fused_group_call(x_in, group, act_flags, *, negative_slope, out_dtype,
                      tile_b_hint, use_buffered):
    """One pallas_call fusing a consecutive group of layers."""
    B, pin = x_in.shape
    num_layers = len(group)
    pdims = [pin] + [g["w"].shape[1] for g in group]
    compute_dtype = group[0]["w"].dtype

    capacity = _vmem_capacity_bytes()
    budget = capacity - (8 << 20)            # headroom for compiler temps

    wbuf = 1 if use_buffered else 2          # weight buffer count
    weight_bytes = sum(
        g["w"].size * g["w"].dtype.itemsize * wbuf + g["b"].size * 4 * wbuf
        for g in group)

    c_bytes = jnp.dtype(compute_dtype).itemsize
    x_bytes = jnp.dtype(x_in.dtype).itemsize
    o_bytes = jnp.dtype(out_dtype).itemsize
    # Per-batch-row VMEM: double-buffered x + out tiles plus the widest
    # in-flight activation pair (h in compute dtype, y in f32), x2 fudge.
    act_row = max(pdims[i] * c_bytes + pdims[i + 1] * 4
                  for i in range(num_layers))
    row_bytes = 2 * pin * x_bytes + 2 * pdims[-1] * o_bytes + 2 * act_row

    rows_avail = max(_SUBLANE, (budget - weight_bytes) // max(row_bytes, 1))
    tile_b = min(rows_avail, 1024, _round_up(B, _SUBLANE))
    if tile_b_hint is not None:
        tile_b = min(tile_b, max(_SUBLANE, int(tile_b_hint)))
    if tile_b >= 256:
        tile_b = (tile_b // 256) * 256       # full 256-row MXU tiles (v6e/v7x)
    else:
        tile_b = max(_SUBLANE, (tile_b // _SUBLANE) * _SUBLANE)
    # Guarantee >= 2 grid steps when the batch allows it so the "parallel"
    # axis can actually shard across v7x's two TensorCores.
    if pl.cdiv(B, tile_b) == 1 and tile_b >= 2 * _SUBLANE:
        tile_b = max(_SUBLANE, _round_up(pl.cdiv(tile_b, 2), _SUBLANE))

    grid = (pl.cdiv(B, tile_b),)

    # Budget-driven VMEM limit, clamped below physical capacity.
    vmem_need = int(1.5 * (weight_bytes + tile_b * row_bytes)) + (4 << 20)
    vmem_limit = min(max(vmem_need, 32 << 20), capacity - (2 << 20))

    weight_kwargs = (
        {"pipeline_mode": pl.Buffered(1)} if use_buffered else {})

    in_specs = [pl.BlockSpec((tile_b, pin), lambda i: (i, 0))]
    inputs = [x_in]
    for g in group:
        pi, po = g["w"].shape
        # Grid-invariant blocks: weights/biases stay VMEM-resident across all
        # batch tiles, single-buffered when Buffered(1) is available.
        in_specs.append(pl.BlockSpec((pi, po), lambda i: (0, 0),
                                     **weight_kwargs))
        in_specs.append(pl.BlockSpec((1, po), lambda i: (0, 0),
                                     **weight_kwargs))
        inputs += [g["w"], g["b"]]

    kernel = functools.partial(
        _mlp_fused_kernel,
        num_layers=num_layers,
        negative_slope=negative_slope,
        act_flags=tuple(act_flags),
        compute_dtype=compute_dtype,
    )

    return pl.pallas_call(
        kernel,
        out_shape=jax.ShapeDtypeStruct((B, pdims[-1]), out_dtype),
        grid=grid,
        in_specs=in_specs,
        out_specs=pl.BlockSpec((tile_b, pdims[-1]), lambda i: (i, 0)),
        compiler_params=pltpu.CompilerParams(
            dimension_semantics=("parallel",),   # megacore batch sharding
            vmem_limit_bytes=int(vmem_limit),
        ),
    )(*inputs)


def mlp_forward(params, x, *, negative_slope=0.1, with_output_nonlinearity=True,
                tile_b=None, matmul_dtype=None):
    """params: output of prepare_mlp_params (preferred — prepare once, reuse),
    or raw [{'w': (in, out), 'b': (out,)}] which is prepared on the fly.
    x: (B, input_size)."""
    if not (params and isinstance(params[0], dict) and "in_dim" in params[0]):
        params = prepare_mlp_params(params, matmul_dtype=matmul_dtype)

    B, in_dim = x.shape
    num_layers = len(params)
    assert params[0]["in_dim"] == in_dim, (params[0]["in_dim"], in_dim)
    out_dim = params[-1]["out_dim"]
    act_flags = [with_output_nonlinearity or (i < num_layers - 1)
                 for i in range(num_layers)]

    # Split the layer stack into consecutive groups whose padded weights fit
    # the per-generation VMEM budget; normally one group == the whole network,
    # so intermediates never touch HBM.
    capacity = _vmem_capacity_bytes()
    w_budget = max(8 << 20, capacity - (24 << 20))   # reserve room for tiles
    groups, cur, cur_bytes = [], [], 0
    for p in params:
        nbytes = p["w"].size * p["w"].dtype.itemsize + p["b"].size * 4
        if cur and cur_bytes + nbytes > w_budget:
            groups.append(cur)
            cur, cur_bytes = [], 0
        # TODO(synk): a single layer wider than the VMEM budget would need
        # N-blocking of that layer's weight (extra grid axis); not implemented.
        cur.append(p)
        cur_bytes += nbytes
    if cur:
        groups.append(cur)

    # Feature-pad x only when its width is not lane-aligned.  The batch axis
    # is handled with a ragged last grid tile: no batch padding, no out slice.
    pin0 = params[0]["w"].shape[0]
    h = x
    if in_dim != pin0:
        h = jnp.zeros((B, pin0), x.dtype).at[:, :in_dim].set(x)

    layer_idx = 0
    for gi, group in enumerate(groups):
        gflags = act_flags[layer_idx:layer_idx + len(group)]
        layer_idx += len(group)
        last = gi == len(groups) - 1
        out_dtype = x.dtype if last else group[0]["w"].dtype
        use_buf = _BUFFERED_OK[0]
        try:
            h = _fused_group_call(h, group, gflags,
                                  negative_slope=negative_slope,
                                  out_dtype=out_dtype, tile_b_hint=tile_b,
                                  use_buffered=use_buf)
        except Exception:
            if not use_buf:
                raise
            _BUFFERED_OK[0] = False   # Buffered(1) unsupported -> default path
            h = _fused_group_call(h, group, gflags,
                                  negative_slope=negative_slope,
                                  out_dtype=out_dtype, tile_b_hint=tile_b,
                                  use_buffered=False)

    if out_dim != h.shape[1]:
        h = h[:, :out_dim]
    return h


# ----------------------------- parameter init -------------------------------

def _xavier_uniform(key, fan_in, fan_out, dtype=jnp.float32):
    # Matches torch.nn.init.xavier_uniform_ (gain=1).
    bound = (6.0 / (fan_in + fan_out)) ** 0.5
    # Stored as (in, out): transpose of PyTorch's (out, in) weight layout.
    return jax.random.uniform(key, (fan_in, fan_out), dtype=dtype,
                              minval=-bound, maxval=bound)


def _linear_bias_init(key, fan_in, fan_out, dtype=jnp.float32):
    # Matches nn.Linear default bias init: U(-1/sqrt(fan_in), 1/sqrt(fan_in)).
    bound = 1.0 / (fan_in ** 0.5)
    return jax.random.uniform(key, (fan_out,), dtype=dtype,
                              minval=-bound, maxval=bound)


def init_mlp_params(key, input_size, output_size, hidden_list):
    in_dims = [input_size] + list(hidden_list)
    out_dims = list(hidden_list) + [output_size]
    params = []
    for fi, fo in zip(in_dims, out_dims):
        key, kw, kb = jax.random.split(key, 3)
        params.append({"w": _xavier_uniform(kw, fi, fo),
                       "b": _linear_bias_init(kb, fi, fo)})
    return params


# ------------------------------- reference ----------------------------------

def mlp_reference(params, x, *, negative_slope=0.1,
                  with_output_nonlinearity=True):
    n = len(params)
    h = x.astype(jnp.float32)
    for i, p in enumerate(params):
        h = h @ p["w"] + p["b"]
        if with_output_nonlinearity or (i < n - 1):
            h = jnp.where(h > 0.0, h, negative_slope * h)
    return h.astype(x.dtype)


if __name__ == "__main__":
    key = jax.random.PRNGKey(0)

    batch = 8
    input_size = 32
    hidden_list = [64, 64]
    output_size = 16

    k_params, k_x, k_x2 = jax.random.split(key, 3)
    raw_params = init_mlp_params(k_params, input_size, output_size, hidden_list)
    x = jax.random.normal(k_x, (batch, input_size), dtype=jnp.float32)

    # One-time padded f32 params (reused across calls).
    params_f32 = prepare_mlp_params(raw_params, matmul_dtype=None)

    # f32 matmul path vs f32 reference (tight tolerance).
    y = mlp_forward(params_f32, x, negative_slope=0.1,
                    with_output_nonlinearity=True)
    y = jax.block_until_ready(y)
    assert y.shape == (batch, output_size), y.shape
    assert bool(jnp.all(jnp.isfinite(y)))
    y_ref = mlp_reference(raw_params, x, negative_slope=0.1,
                          with_output_nonlinearity=True)
    assert bool(jnp.allclose(y, y_ref, atol=1e-5, rtol=1e-5))

    # Ragged batch (partial last grid tile, no batch padding in the wrapper).
    x_ragged = jax.random.normal(k_x2, (13, input_size), dtype=jnp.float32)
    y_ragged = jax.block_until_ready(
        mlp_forward(params_f32, x_ragged, negative_slope=0.1,
                    with_output_nonlinearity=True))
    y_ragged_ref = mlp_reference(raw_params, x_ragged, negative_slope=0.1,
                                 with_output_nonlinearity=True)
    assert y_ragged.shape == (13, output_size)
    assert bool(jnp.allclose(y_ragged, y_ragged_ref, atol=1e-5, rtol=1e-5))

    # bf16 matmul path (pre-cast weights, f32 accumulation): looser tolerance
    # vs the f32 reference is expected and documented.
    params_bf16 = prepare_mlp_params(raw_params, matmul_dtype=jnp.bfloat16)
    y_bf16 = jax.block_until_ready(
        mlp_forward(params_bf16, x, negative_slope=0.1,
                    with_output_nonlinearity=True))
    assert y_bf16.shape == (batch, output_size)
    assert bool(jnp.allclose(y_bf16, y_ref, atol=5e-2, rtol=5e-2))

    print("KERNEL_OK")
</pallas_src>

<mosaic_0001>
module attributes {stable_mosaic.version = 11 : i64} {
  func.func @_mlp_fused_kernel(%arg0: i32, %arg1: memref<8x128xf32, #tpu.memory_space<vmem>>, %arg2: memref<128x128xf32, #tpu.memory_space<vmem>>, %arg3: memref<1x128xf32, #tpu.memory_space<vmem>>, %arg4: memref<128x128xf32, #tpu.memory_space<vmem>>, %arg5: memref<1x128xf32, #tpu.memory_space<vmem>>, %arg6: memref<128x128xf32, #tpu.memory_space<vmem>>, %arg7: memref<1x128xf32, #tpu.memory_space<vmem>>, %arg8: memref<8x128xf32, #tpu.memory_space<vmem>>) attributes {dimension_semantics = [#tpu.dimension_semantics<parallel>], iteration_bounds = array<i64: 1>, scalar_prefetch = 0 : i64, scratch_operands = 0 : i64, tpu.core_type = #tpu.core_type<tc>, window_params = [{transform_indices = @transform_0, window_bounds = array<i64: 8, 128>}, {pipeline_mode = #tpu.pipeline_mode<synchronous>, transform_indices = @transform_1, window_bounds = array<i64: 128, 128>}, {pipeline_mode = #tpu.pipeline_mode<synchronous>, transform_indices = @transform_2, window_bounds = array<i64: 1, 128>}, {pipeline_mode = #tpu.pipeline_mode<synchronous>, transform_indices = @transform_3, window_bounds = array<i64: 128, 128>}, {pipeline_mode = #tpu.pipeline_mode<synchronous>, transform_indices = @transform_4, window_bounds = array<i64: 1, 128>}, {pipeline_mode = #tpu.pipeline_mode<synchronous>, transform_indices = @transform_5, window_bounds = array<i64: 128, 128>}, {pipeline_mode = #tpu.pipeline_mode<synchronous>, transform_indices = @transform_6, window_bounds = array<i64: 1, 128>}, {transform_indices = @transform_7, window_bounds = array<i64: 8, 128>}]} {
    %c0 = arith.constant 0 : index
    %c0_0 = arith.constant 0 : index
    %0 = vector.load %arg1[%c0, %c0_0] : memref<8x128xf32, #tpu.memory_space<vmem>>, vector<8x128xf32>
    %c0_1 = arith.constant 0 : index
    %c0_2 = arith.constant 0 : index
    %1 = vector.load %arg2[%c0_1, %c0_2] : memref<128x128xf32, #tpu.memory_space<vmem>>, vector<128x128xf32>
    %cst = arith.constant dense<0.000000e+00> : vector<8x128xf32>
    %2 = tpu.matmul %0, %1, %cst {dimension_numbers = #tpu.dot_dimension_numbers<[1], [0], [0], [1], [0, 0, 1, 1], [], []>} : vector<8x128xf32>, vector<128x128xf32>, vector<8x128xf32> -> vector<8x128xf32>
    %c0_3 = arith.constant 0 : index
    %c0_4 = arith.constant 0 : index
    %3 = vector.load %arg3[%c0_3, %c0_4] : memref<1x128xf32, #tpu.memory_space<vmem>>, vector<1x128xf32>
    %4 = vector.broadcast %3 : vector<1x128xf32> to vector<8x128xf32>
    %5 = arith.addf %2, %4 : vector<8x128xf32>
    %cst_5 = arith.constant 0.000000e+00 : f32
    %6 = vector.broadcast %cst_5 : f32 to vector<8x128xf32>
    %7 = arith.cmpf ogt, %5, %6 : vector<8x128xf32>
    %cst_6 = arith.constant 1.000000e-01 : f32
    %8 = vector.broadcast %cst_6 : f32 to vector<8x128xf32>
    %9 = arith.mulf %8, %5 : vector<8x128xf32>
    %10 = arith.select %7, %5, %9 : vector<8x128xi1>, vector<8x128xf32>
    %c0_7 = arith.constant 0 : index
    %c0_8 = arith.constant 0 : index
    %11 = vector.load %arg4[%c0_7, %c0_8] : memref<128x128xf32, #tpu.memory_space<vmem>>, vector<128x128xf32>
    %cst_9 = arith.constant dense<0.000000e+00> : vector<8x128xf32>
    %12 = tpu.matmul %10, %11, %cst_9 {dimension_numbers = #tpu.dot_dimension_numbers<[1], [0], [0], [1], [0, 0, 1, 1], [], []>} : vector<8x128xf32>, vector<128x128xf32>, vector<8x128xf32> -> vector<8x128xf32>
    %c0_10 = arith.constant 0 : index
    %c0_11 = arith.constant 0 : index
    %13 = vector.load %arg5[%c0_10, %c0_11] : memref<1x128xf32, #tpu.memory_space<vmem>>, vector<1x128xf32>
    %14 = vector.broadcast %13 : vector<1x128xf32> to vector<8x128xf32>
    %15 = arith.addf %12, %14 : vector<8x128xf32>
    %cst_12 = arith.constant 0.000000e+00 : f32
    %16 = vector.broadcast %cst_12 : f32 to vector<8x128xf32>
    %17 = arith.cmpf ogt, %15, %16 : vector<8x128xf32>
    %cst_13 = arith.constant 1.000000e-01 : f32
    %18 = vector.broadcast %cst_13 : f32 to vector<8x128xf32>
    %19 = arith.mulf %18, %15 : vector<8x128xf32>
    %20 = arith.select %17, %15, %19 : vector<8x128xi1>, vector<8x128xf32>
    %c0_14 = arith.constant 0 : index
    %c0_15 = arith.constant 0 : index
    %21 = vector.load %arg6[%c0_14, %c0_15] : memref<128x128xf32, #tpu.memory_space<vmem>>, vector<128x128xf32>
    %cst_16 = arith.constant dense<0.000000e+00> : vector<8x128xf32>
    %22 = tpu.matmul %20, %21, %cst_16 {dimension_numbers = #tpu.dot_dimension_numbers<[1], [0], [0], [1], [0, 0, 1, 1], [], []>} : vector<8x128xf32>, vector<128x128xf32>, vector<8x128xf32> -> vector<8x128xf32>
    %c0_17 = arith.constant 0 : index
    %c0_18 = arith.constant 0 : index
    %23 = vector.load %arg7[%c0_17, %c0_18] : memref<1x128xf32, #tpu.memory_space<vmem>>, vector<1x128xf32>
    %24 = vector.broadcast %23 : vector<1x128xf32> to vector<8x128xf32>
    %25 = arith.addf %22, %24 : vector<8x128xf32>
    %cst_19 = arith.constant 0.000000e+00 : f32
    %26 = vector.broadcast %cst_19 : f32 to vector<8x128xf32>
    %27 = arith.cmpf ogt, %25, %26 : vector<8x128xf32>
    %cst_20 = arith.constant 1.000000e-01 : f32
    %28 = vector.broadcast %cst_20 : f32 to vector<8x128xf32>
    %29 = arith.mulf %28, %25 : vector<8x128xf32>
    %30 = arith.select %27, %25, %29 : vector<8x128xi1>, vector<8x128xf32>
    %c0_21 = arith.constant 0 : index
    %c0_22 = arith.constant 0 : index
    %31 = vector.load %arg8[%c0_21, %c0_22] : memref<8x128xf32, #tpu.memory_space<vmem>>, vector<8x128xf32>
    tpu.vector_store %arg8[%c0_21, %c0_22], %30 {strides = array<i32>} : memref<8x128xf32, #tpu.memory_space<vmem>>, vector<8x128xf32>,
    return
  }
  func.func @transform_0(%arg0: i32) -> (i32, i32) {
    %c0_i32 = arith.constant 0 : i32
    %c0_i32_0 = arith.constant 0 : i32
    return %arg0, %c0_i32 : i32, i32
  }
  func.func @transform_1(%arg0: i32) -> (i32, i32) {
    %c0_i32 = arith.constant 0 : i32
    %c0_i32_0 = arith.constant 0 : i32
    %c0_i32_1 = arith.constant 0 : i32
    return %c0_i32, %c0_i32_0 : i32, i32
  }
  func.func @transform_2(%arg0: i32) -> (i32, i32) {
    %c0_i32 = arith.constant 0 : i32
    %c0_i32_0 = arith.constant 0 : i32
    %c0_i32_1 = arith.constant 0 : i32
    return %c0_i32, %c0_i32_0 : i32, i32
  }
  func.func @transform_3(%arg0: i32) -> (i32, i32) {
    %c0_i32 = arith.constant 0 : i32
    %c0_i32_0 = arith.constant 0 : i32
    %c0_i32_1 = arith.constant 0 : i32
    return %c0_i32, %c0_i32_0 : i32, i32
  }
  func.func @transform_4(%arg0: i32) -> (i32, i32) {
    %c0_i32 = arith.constant 0 : i32
    %c0_i32_0 = arith.constant 0 : i32
    %c0_i32_1 = arith.constant 0 : i32
    return %c0_i32, %c0_i32_0 : i32, i32
  }
  func.func @transform_5(%arg0: i32) -> (i32, i32) {
    %c0_i32 = arith.constant 0 : i32
    %c0_i32_0 = arith.constant 0 : i32
    %c0_i32_1 = arith.constant 0 : i32
    return %c0_i32, %c0_i32_0 : i32, i32
  }
  func.func @transform_6(%arg0: i32) -> (i32, i32) {
    %c0_i32 = arith.constant 0 : i32
    %c0_i32_0 = arith.constant 0 : i32
    %c0_i32_1 = arith.constant 0 : i32
    return %c0_i32, %c0_i32_0 : i32, i32
  }
  func.func @transform_7(%arg0: i32) -> (i32, i32) {
    %c0_i32 = arith.constant 0 : i32
    %c0_i32_0 = arith.constant 0 : i32
    return %arg0, %c0_i32 : i32, i32
  }
}

module attributes {stable_mosaic.version = 11 : i64} {
  func.func @_mlp_fused_kernel(%arg0: i32, %arg1: memref<8x128xf32, #tpu.memory_space<vmem>>, %arg2: memref<128x128xf32, #tpu.memory_space<vmem>>, %arg3: memref<1x128xf32, #tpu.memory_space<vmem>>, %arg4: memref<128x128xf32, #tpu.memory_space<vmem>>, %arg5: memref<1x128xf32, #tpu.memory_space<vmem>>, %arg6: memref<128x128xf32, #tpu.memory_space<vmem>>, %arg7: memref<1x128xf32, #tpu.memory_space<vmem>>, %arg8: memref<8x128xf32, #tpu.memory_space<vmem>>) attributes {dimension_semantics = [#tpu.dimension_semantics<parallel>], iteration_bounds = array<i64: 1>, scalar_prefetch = 0 : i64, scratch_operands = 0 : i64, tpu.core_type = #tpu.core_type<tc>, window_params = [{transform_indices = @transform_0, window_bounds = array<i64: 8, 128>}, {pipeline_mode = #tpu.pipeline_mode<synchronous>, transform_indices = @transform_1, window_bounds = array<i64: 128, 128>}, {pipeline_mode = #tpu.pipeline_mode<synchronous>, transform_indices = @transform_2, window_bounds = array<i64: 1, 128>}, {pipeline_mode = #tpu.pipeline_mode<synchronous>, transform_indices = @transform_3, window_bounds = array<i64: 128, 128>}, {pipeline_mode = #tpu.pipeline_mode<synchronous>, transform_indices = @transform_4, window_bounds = array<i64: 1, 128>}, {pipeline_mode = #tpu.pipeline_mode<synchronous>, transform_indices = @transform_5, window_bounds = array<i64: 128, 128>}, {pipeline_mode = #tpu.pipeline_mode<synchronous>, transform_indices = @transform_6, window_bounds = array<i64: 1, 128>}, {transform_indices = @transform_7, window_bounds = array<i64: 8, 128>}]} {
    %c0 = arith.constant 0 : index
    %c0_0 = arith.constant 0 : index
    %0 = vector.load %arg1[%c0, %c0_0] : memref<8x128xf32, #tpu.memory_space<vmem>>, vector<8x128xf32>
    %c0_1 = arith.constant 0 : index
    %c0_2 = arith.constant 0 : index
    %1 = vector.load %arg2[%c0_1, %c0_2] : memref<128x128xf32, #tpu.memory_space<vmem>>, vector<128x128xf32>
    %cst = arith.constant dense<0.000000e+00> : vector<8x128xf32>
    %2 = tpu.matmul %0, %1, %cst {dimension_numbers = #tpu.dot_dimension_numbers<[1], [0], [0], [1], [0, 0, 1, 1], [], []>} : vector<8x128xf32>, vector<128x128xf32>, vector<8x128xf32> -> vector<8x128xf32>
    %c0_3 = arith.constant 0 : index
    %c0_4 = arith.constant 0 : index
    %3 = vector.load %arg3[%c0_3, %c0_4] : memref<1x128xf32, #tpu.memory_space<vmem>>, vector<1x128xf32>
    %4 = vector.broadcast %3 : vector<1x128xf32> to vector<8x128xf32>
    %5 = arith.addf %2, %4 : vector<8x128xf32>
    %cst_5 = arith.constant 0.000000e+00 : f32
    %6 = vector.broadcast %cst_5 : f32 to vector<8x128xf32>
    %7 = arith.cmpf ogt, %5, %6 : vector<8x128xf32>
    %cst_6 = arith.constant 1.000000e-01 : f32
    %8 = vector.broadcast %cst_6 : f32 to vector<8x128xf32>
    %9 = arith.mulf %8, %5 : vector<8x128xf32>
    %10 = arith.select %7, %5, %9 : vector<8x128xi1>, vector<8x128xf32>
    %c0_7 = arith.constant 0 : index
    %c0_8 = arith.constant 0 : index
    %11 = vector.load %arg4[%c0_7, %c0_8] : memref<128x128xf32, #tpu.memory_space<vmem>>, vector<128x128xf32>
    %cst_9 = arith.constant dense<0.000000e+00> : vector<8x128xf32>
    %12 = tpu.matmul %10, %11, %cst_9 {dimension_numbers = #tpu.dot_dimension_numbers<[1], [0], [0], [1], [0, 0, 1, 1], [], []>} : vector<8x128xf32>, vector<128x128xf32>, vector<8x128xf32> -> vector<8x128xf32>
    %c0_10 = arith.constant 0 : index
    %c0_11 = arith.constant 0 : index
    %13 = vector.load %arg5[%c0_10, %c0_11] : memref<1x128xf32, #tpu.memory_space<vmem>>, vector<1x128xf32>
    %14 = vector.broadcast %13 : vector<1x128xf32> to vector<8x128xf32>
    %15 = arith.addf %12, %14 : vector<8x128xf32>
    %cst_12 = arith.constant 0.000000e+00 : f32
    %16 = vector.broadcast %cst_12 : f32 to vector<8x128xf32>
    %17 = arith.cmpf ogt, %15, %16 : vector<8x128xf32>
    %cst_13 = arith.constant 1.000000e-01 : f32
    %18 = vector.broadcast %cst_13 : f32 to vector<8x128xf32>
    %19 = arith.mulf %18, %15 : vector<8x128xf32>
    %20 = arith.select %17, %15, %19 : vector<8x128xi1>, vector<8x128xf32>
    %c0_14 = arith.constant 0 : index
    %c0_15 = arith.constant 0 : index
    %21 = vector.load %arg6[%c0_14, %c0_15] : memref<128x128xf32, #tpu.memory_space<vmem>>, vector<128x128xf32>
    %cst_16 = arith.constant dense<0.000000e+00> : vector<8x128xf32>
    %22 = tpu.matmul %20, %21, %cst_16 {dimension_numbers = #tpu.dot_dimension_numbers<[1], [0], [0], [1], [0, 0, 1, 1], [], []>} : vector<8x128xf32>, vector<128x128xf32>, vector<8x128xf32> -> vector<8x128xf32>
    %c0_17 = arith.constant 0 : index
    %c0_18 = arith.constant 0 : index
    %23 = vector.load %arg7[%c0_17, %c0_18] : memref<1x128xf32, #tpu.memory_space<vmem>>, vector<1x128xf32>
    %24 = vector.broadcast %23 : vector<1x128xf32> to vector<8x128xf32>
    %25 = arith.addf %22, %24 : vector<8x128xf32>
    %cst_19 = arith.constant 0.000000e+00 : f32
    %26 = vector.broadcast %cst_19 : f32 to vector<8x128xf32>
    %27 = arith.cmpf ogt, %25, %26 : vector<8x128xf32>
    %cst_20 = arith.constant 1.000000e-01 : f32
    %28 = vector.broadcast %cst_20 : f32 to vector<8x128xf32>
    %29 = arith.mulf %28, %25 : vector<8x128xf32>
    %30 = arith.select %27, %25, %29 : vector<8x128xi1>, vector<8x128xf32>
    %c0_21 = arith.constant 0 : index
    %c0_22 = arith.constant 0 : index
    %31 = vector.load %arg8[%c0_21, %c0_22] : memref<8x128xf32, #tpu.memory_space<vmem>>, vector<8x128xf32>
    tpu.vector_store %arg8[%c0_21, %c0_22], %30 {strides = array<i32>} : memref<8x128xf32, #tpu.memory_space<vmem>>, vector<8x128xf32>,
    return
  }
  func.func @transform_0(%arg0: i32) -> (i32, i32) {
    %c0_i32 = arith.constant 0 : i32
    %c0_i32_0 = arith.constant 0 : i32
    return %arg0, %c0_i32 : i32, i32
  }
  func.func @transform_1(%arg0: i32) -> (i32, i32) {
    %c0_i32 = arith.constant 0 : i32
    %c0_i32_0 = arith.constant 0 : i32
    %c0_i32_1 = arith.constant 0 : i32
    return %c0_i32, %c0_i32_0 : i32, i32
  }
  func.func @transform_2(%arg0: i32) -> (i32, i32) {
    %c0_i32 = arith.constant 0 : i32
    %c0_i32_0 = arith.constant 0 : i32
    %c0_i32_1 = arith.constant 0 : i32
    return %c0_i32, %c0_i32_0 : i32, i32
  }
  func.func @transform_3(%arg0: i32) -> (i32, i32) {
    %c0_i32 = arith.constant 0 : i32
    %c0_i32_0 = arith.constant 0 : i32
    %c0_i32_1 = arith.constant 0 : i32
    return %c0_i32, %c0_i32_0 : i32, i32
  }
  func.func @transform_4(%arg0: i32) -> (i32, i32) {
    %c0_i32 = arith.constant 0 : i32
    %c0_i32_0 = arith.constant 0 : i32
    %c0_i32_1 = arith.constant 0 : i32
    return %c0_i32, %c0_i32_0 : i32, i32
  }
  func.func @transform_5(%arg0: i32) -> (i32, i32) {
    %c0_i32 = arith.constant 0 : i32
    %c0_i32_0 = arith.constant 0 : i32
    %c0_i32_1 = arith.constant 0 : i32
    return %c0_i32, %c0_i32_0 : i32, i32
  }
  func.func @transform_6(%arg0: i32) -> (i32, i32) {
    %c0_i32 = arith.constant 0 : i32
    %c0_i32_0 = arith.constant 0 : i32
    %c0_i32_1 = arith.constant 0 : i32
    return %c0_i32, %c0_i32_0 : i32, i32
  }
  func.func @transform_7(%arg0: i32) -> (i32, i32) {
    %c0_i32 = arith.constant 0 : i32
    %c0_i32_0 = arith.constant 0 : i32
    return %arg0, %c0_i32 : i32, i32
  }
}

</mosaic_0001>

<bundles_post_ra>
// kernel: tpu_custom_call.1
= control target key start
LH: loop header
LB: loop body
LE: loop exit
PB: predicated region body
PF: predicated region fallthrough
CT: control target
= control target key end

     0   :  { %12 = vsyncpa [#allocation3], 0  ;;  %s447_s0 = inlined_call_operand.hbm [shape: f32[8,128], index: 0, kind: input, shape index: {}]   ;;  %s448_s1 = inlined_call_operand.hbm [shape: f32[128,128], index: 1, kind: input, shape index: {}]   ;;  %s449_s2 = inlined_call_operand.vmem [shape: f32[1,128], index: 2, kind: input, shape index: {}]   ;;  %s450_s3 = inlined_call_operand.hbm [shape: f32[128,128], index: 3, kind: input, shape index: {}]   ;;  %s451_s4 = inlined_call_operand.vmem [shape: f32[1,128], index: 4, kind: input, shape index: {}]   ;;  %s452_s5 = inlined_call_operand.hbm [shape: f32[128,128], index: 5, kind: input, shape index: {}]   ;;  %s453_s6 = inlined_call_operand.vmem [shape: f32[1,128], index: 6, kind: input, shape index: {}]   ;;  %s454_s7 = inlined_call_operand.hbm [shape: f32[8,128], index: 7, kind: output, shape index: {}]  }
   0x1   :  { %13 = vsyncpa [#allocation6], 0 }
   0x2   :  { %14 = vsyncpa [#allocation9], 0  ;;  %s31_s26 = sshll.u32 %s448_s1, 4  ;;  %s32_s26 = int_to_ptr.hbm [resolvable:$true] %s31_s26 }
   0x3   :  { %15 = vsyncpa [#allocation4], 0  ;;  %s376_s27 = smov [#allocation5]   ;;  %s21_s8 = sshll.u32 %s447_s0, 4  ;;  %s22_s8 = int_to_ptr.hbm [resolvable:$true] %s21_s8 }
   0x4   :  { %s33_s28 = sshll.u32 %s376_s27, 4  ;;  %s377_s9 = smov 128   ;;  %s34_s28 = int_to_ptr.vmem [resolvable:$true] %s33_s28 }
   0x5   :  { %s378_s10 = smov 8   ;;  %s379_s11 = smov [#allocation2]  }
   0x6   :  { %39 = dma.hbm_to_vmem [thread:$0]  %s32_s26, 2048, %s34_s28, [#allocation6], %s377_s9, %s377_s9, %s378_s10  }
   0x7   :  { %s23_s12 = sshll.u32 %s379_s11, 4  ;;  %s46_s15 = sshll.u32 %s450_s3, 4  ;;  %s24_s12 = int_to_ptr.vmem [resolvable:$true] %s23_s12  ;;  %s47_s15 = int_to_ptr.hbm [resolvable:$true] %s46_s15 }
   0x8   :  { %26 = dma.hbm_to_vmem [thread:$0]  %s22_s8, 128, %s24_s12, [#allocation3]  }
   0x9   :  { %s61_s17 = sshll.u32 %s452_s5, 4  ;;  %s380_s18 = smov [#allocation7]   ;;  %s62_s17 = int_to_ptr.hbm [resolvable:$true] %s61_s17 }
   0xa   :  { %s48_s19 = sshll.u32 %s380_s18, 4  ;;  %s381_s0 = smov [#allocation8]   ;;  %s49_s19 = int_to_ptr.vmem [resolvable:$true] %s48_s19 }
   0xb   :  { %54 = dma.hbm_to_vmem [thread:$0]  %s47_s15, 2048, %s49_s19, [#allocation6], %s377_s9, %s377_s9, %s378_s10  }
   0xc   :  { %s63_s20 = sshll.u32 %s381_s0, 4  ;;  %s64_s20 = int_to_ptr.vmem [resolvable:$true] %s63_s20 }
   0xd   :  { %69 = dma.hbm_to_vmem [thread:$0]  %s62_s17, 2048, %s64_s20, [#allocation9], %s377_s9, %s377_s9, %s378_s10  }
   0xe   :  { %368 = dma.done.wait [#allocation3], 128  }
   0xf   :  { %369 = vsyncadd [#allocation3], 4294967168 }
  0x10   :  { %370 = dma.done.wait [#allocation6], 4096  }
  0x11   :  { %371 = vsyncadd [#allocation6], 4294963200 }
  0x12   :  { %372 = dma.done.wait [#allocation9], 2048  }
  0x13   :  { %373 = vsyncadd [#allocation9], 4294965248  ;;  %v104_v0 = vld [vmem:[#allocation5 + $0x78] sm:$0xff]  ;;  %v103_v1 = vld [vmem:[#allocation5 + $0x70] sm:$0xff]  ;;  %s382_s24 = smov [#allocation10]   ;;  %s226_s28 = sshll.u32 %s454_s7, 4  ;;  %s227_s28 = int_to_ptr.hbm [resolvable:$true] %s226_s28 }
  0x14   :  { %109 = vmatpush.msra.mxu0 %v104_v0  ;;  %v102_v2 = vld [vmem:[#allocation5 + $0x68] sm:$0xff]  ;;  %v101_v3 = vld [vmem:[#allocation5 + $0x60] sm:$0xff]  ;;  %v147_v4 = vld [vmem:[#allocation7 + $0x78] sm:$0xff]  ;;  %s224_s25 = sshll.u32 %s382_s24, 4  ;;  %s225_s25 = int_to_ptr.vmem [resolvable:$true] %s224_s25 }
  0x15   :  { %v100_v5 = vld [vmem:[#allocation5 + $0x58] sm:$0xff]  ;;  %152 = vmatpush.msra.mxu1 %v147_v4  ;;  %v146_v6 = vld [vmem:[#allocation7 + $0x70] sm:$0xff]  ;;  %v145_v7 = vld [vmem:[#allocation7 + $0x68] sm:$0xff] }
  0x16   :  { %110 = vmatpush.msra.mxu0 %v103_v1  ;;  %v99_v8 = vld [vmem:[#allocation5 + $0x50] sm:$0xff]  ;;  %v144_v9 = vld [vmem:[#allocation7 + $0x60] sm:$0xff]  ;;  %v98_v10 = vld [vmem:[#allocation5 + $0x48] sm:$0xff] }
  0x17   :  { %153 = vmatpush.msra.mxu1 %v146_v6  ;;  %v143_v11 = vld [vmem:[#allocation7 + $0x58] sm:$0xff]  ;;  %v97_v12 = vld [vmem:[#allocation5 + $0x40] sm:$0xff]  ;;  %v142_v13 = vld [vmem:[#allocation7 + $0x50] sm:$0xff] }
  0x18   :  { %111 = vmatpush.msra.mxu0 %v102_v2  ;;  %v96_v14 = vld [vmem:[#allocation5 + $0x38] sm:$0xff]  ;;  %v141_v15 = vld [vmem:[#allocation7 + $0x48] sm:$0xff]  ;;  %v95_v16 = vld [vmem:[#allocation5 + $0x30] sm:$0xff] }
  0x19   :  { %154 = vmatpush.msra.mxu1 %v145_v7  ;;  %v140_v17 = vld [vmem:[#allocation7 + $0x40] sm:$0xff]  ;;  %v94_v18 = vld [vmem:[#allocation5 + $0x28] sm:$0xff]  ;;  %v139_v19 = vld [vmem:[#allocation7 + $0x38] sm:$0xff] }
  0x1a   :  { %112 = vmatpush.msra.mxu0 %v101_v3  ;;  %v93_v20 = vld [vmem:[#allocation5 + $0x20] sm:$0xff]  ;;  %v138_v21 = vld [vmem:[#allocation7 + $0x30] sm:$0xff]  ;;  %v92_v22 = vld [vmem:[#allocation5 + $0x18] sm:$0xff] }
  0x1b   :  { %155 = vmatpush.msra.mxu1 %v144_v9  ;;  %v137_v23 = vld [vmem:[#allocation7 + $0x28] sm:$0xff]  ;;  %v91_v24 = vld [vmem:[#allocation5 + $0x10] sm:$0xff]  ;;  %v136_v25 = vld [vmem:[#allocation7 + $0x20] sm:$0xff] }
  0x1c   :  { %113 = vmatpush.msra.mxu0 %v100_v5  ;;  %v90_v26 = vld [vmem:[#allocation5 + $0x8] sm:$0xff]  ;;  %v135_v27 = vld [vmem:[#allocation7 + $0x18] sm:$0xff]  ;;  %v89_v28 = vld [vmem:[#allocation5] sm:$0xff] }
  0x1d   :  { %156 = vmatpush.msra.mxu1 %v143_v11  ;;  %v88_v29 = vld [vmem:[#allocation2] sm:$0xff]  ;;  %v134_v30 = vld [vmem:[#allocation7 + $0x10] sm:$0xff]  ;;  %v133_v31 = vld [vmem:[#allocation7 + $0x8] sm:$0xff] }
  0x1e   :  { %114 = vmatpush.msra.mxu0 %v99_v8  ;;  %v132_v32 = vld [vmem:[#allocation7] sm:$0xff]  ;;  %v190_v33 = vld [vmem:[#allocation8 + $0x78] sm:$0xff]  ;;  %v189_v34 = vld [vmem:[#allocation8 + $0x70] sm:$0xff] }
  0x1f   :  { %157 = vmatpush.msra.mxu1 %v142_v13  ;;  %195 = vmatpush.msra.mxu2 %v190_v33  ;;  %v188_v35 = vld [vmem:[#allocation8 + $0x68] sm:$0xff]  ;;  %v187_v36 = vld [vmem:[#allocation8 + $0x60] sm:$0xff]  ;;  %v186_v37 = vld [vmem:[#allocation8 + $0x58] sm:$0xff] }
  0x20   :  { %115 = vmatpush.msra.mxu0 %v98_v10  ;;  %v185_v38 = vld [vmem:[#allocation8 + $0x50] sm:$0xff]  ;;  %v184_v39 = vld [vmem:[#allocation8 + $0x48] sm:$0xff]  ;;  %v183_v40 = vld [vmem:[#allocation8 + $0x40] sm:$0xff] }
  0x21   :  { %158 = vmatpush.msra.mxu1 %v141_v15  ;;  %196 = vmatpush.msra.mxu2 %v189_v34  ;;  %v182_v41 = vld [vmem:[#allocation8 + $0x38] sm:$0xff]  ;;  %v181_v42 = vld [vmem:[#allocation8 + $0x30] sm:$0xff]  ;;  %v180_v43 = vld [vmem:[#allocation8 + $0x28] sm:$0xff] }
  0x22   :  { %116 = vmatpush.msra.mxu0 %v97_v12  ;;  %v179_v44 = vld [vmem:[#allocation8 + $0x20] sm:$0xff]  ;;  %v178_v45 = vld [vmem:[#allocation8 + $0x18] sm:$0xff]  ;;  %v177_v51 = vld [vmem:[#allocation8 + $0x10] sm:$0xff] }
  0x23   :  { %159 = vmatpush.msra.mxu1 %v140_v17  ;;  %197 = vmatpush.msra.mxu2 %v188_v35  ;;  %v245_v46 = vld [vmem:[%s449_s2] ss:$0 sm:$0xff]  ;;  %v176_v52 = vld [vmem:[#allocation8 + $0x8] sm:$0xff]  ;;  %v175_v53 = vld [vmem:[#allocation8] sm:$0xff] }
  0x24   :  { %117 = vmatpush.msra.mxu0 %v96_v14  ;;  %v246_v54 = vld [vmem:[%s451_s4] ss:$0 sm:$0xff] }
  0x25   :  { %160 = vmatpush.msra.mxu1 %v139_v19  ;;  %198 = vmatpush.msra.mxu2 %v187_v36  ;;  %v247_v59 = vld [vmem:[%s453_s6] ss:$0 sm:$0xff] }
  0x26   :  { %118 = vmatpush.msra.mxu0 %v95_v16 }
  0x27   :  { %161 = vmatpush.msra.mxu1 %v138_v21  ;;  %199 = vmatpush.msra.mxu2 %v186_v37 }
  0x28   :  { %119 = vmatpush.msra.mxu0 %v94_v18 }
  0x29   :  { %162 = vmatpush.msra.mxu1 %v137_v23  ;;  %200 = vmatpush.msra.mxu2 %v185_v38 }
  0x2a   :  { %120 = vmatpush.msra.mxu0 %v93_v20 }
  0x2b   :  { %163 = vmatpush.msra.mxu1 %v136_v25  ;;  %201 = vmatpush.msra.mxu2 %v184_v39 }
  0x2c   :  { %121 = vmatpush.msra.mxu0 %v92_v22 }
  0x2d   :  { %164 = vmatpush.msra.mxu1 %v135_v27  ;;  %202 = vmatpush.msra.mxu2 %v183_v40 }
  0x2e   :  { %122 = vmatpush.msra.mxu0 %v91_v24 }
  0x2f   :  { %165 = vmatpush.msra.mxu1 %v134_v30  ;;  %203 = vmatpush.msra.mxu2 %v182_v41 }
  0x30   :  { %123 = vmatpush.msra.mxu0 %v90_v26 }
  0x31   :  { %166 = vmatpush.msra.mxu1 %v133_v31  ;;  %204 = vmatpush.msra.mxu2 %v181_v42 }
  0x32   :  { %124 = vmatpush.msra.mxu0 %v89_v28 }
  0x33   :  { %125 = vmatmul.f32.vlgmr.msra.gmra.mxu0 %v88_v29  ;;  %167 = vmatpush.msra.mxu1 %v132_v32 }
  0x34   :  { %205 = vmatpush.msra.mxu2 %v180_v43 }
  0x36   :  { %206 = vmatpush.msra.mxu2 %v179_v44 }
  0x38   :  { %207 = vmatpush.msra.mxu2 %v178_v45 }
  0x3a   :  { %208 = vmatpush.msra.mxu2 %v177_v51 }
  0x3c   :  { %209 = vmatpush.msra.mxu2 %v176_v52 }
  0x3e   :  { %210 = vmatpush.msra.mxu2 %v175_v53 }
  0xb0   :  { %v126_v47 = vpop.f32.mrf.mxu0 }
  0xb1   :  { %v127_v48 = vadd.f32 %v245_v46, %v126_v47 }
  0xb3   :  { %vm129_vm0 = vcmp.gt.f32.partialorder %v127_v48, 0.0  ;;  %v130_v49 = vmul.f32 0.1, %v127_v48 }
  0xb5   :  { %v131_v50 = vsel %vm129_vm0, %v127_v48, %v130_v49 }
  0xb6   :  { %168 = vmatmul.f32.vlgmr.msra.gmra.mxu1 %v131_v50 }
 0x133   :  { %v169_v55 = vpop.f32.mrf.mxu1 }
 0x134   :  { %v170_v56 = vadd.f32 %v246_v54, %v169_v55 }
 0x136   :  { %vm172_vm1 = vcmp.gt.f32.partialorder %v170_v56, 0.0  ;;  %v173_v57 = vmul.f32 0.1, %v170_v56 }
 0x138   :  { %v174_v58 = vsel %vm172_vm1, %v170_v56, %v173_v57 }
 0x139   :  { %211 = vmatmul.f32.vlgmr.msra.gmra.mxu2 %v174_v58 }
 0x1bc   :  { %v212_v60 = vpop.f32.mrf.mxu2 }
 0x1bd   :  { %v213_v61 = vadd.f32 %v247_v59, %v212_v60 }
 0x1bf   :  { %vm215_vm2 = vcmp.gt.f32.partialorder %v213_v61, 0.0  ;;  %v216_v62 = vmul.f32 0.1, %v213_v61 }
 0x1c1   :  { %v217_v63 = vsel %vm215_vm2, %v213_v61, %v216_v62 }
 0x1c2   :  { %218 = vst [vmem:[#allocation10] sm:$0xff] %v217_v63 }
 0x1c3   :  { %229 = dma.vmem_to_hbm [thread:$0]  %s225_s25, 128, %s227_s28, [#allocation4]  }
 0x1c4   :  { %374 = dma.done.wait [#allocation4], 128  }
 0x1c5   :  { %375 = vsyncadd [#allocation4], 4294967168 }
 0x1c6   :  { %234 = vsyncpa [#allocation3], 1 }
 0x1c7   :  { %235 = vsyncpa [#allocation6], 1 }
 0x1c8   :  { %236 = vsyncpa [#allocation9], 1 }
 0x1c9   :  { %237 = vsyncpa [#allocation4], 1 }

// kernel: tpu_custom_call.1
= control target key start
LH: loop header
LB: loop body
LE: loop exit
PB: predicated region body
PF: predicated region fallthrough
CT: control target
= control target key end

     0   :  { %12 = vsyncpa [#allocation3], 0  ;;  %s447_s0 = inlined_call_operand.hbm [shape: f32[8,128], index: 0, kind: input, shape index: {}]   ;;  %s448_s1 = inlined_call_operand.hbm [shape: f32[128,128], index: 1, kind: input, shape index: {}]   ;;  %s449_s2 = inlined_call_operand.vmem [shape: f32[1,128], index: 2, kind: input, shape index: {}]   ;;  %s450_s3 = inlined_call_operand.hbm [shape: f32[128,128], index: 3, kind: input, shape index: {}]   ;;  %s451_s4 = inlined_call_operand.vmem [shape: f32[1,128], index: 4, kind: input, shape index: {}]   ;;  %s452_s5 = inlined_call_operand.hbm [shape: f32[128,128], index: 5, kind: input, shape index: {}]   ;;  %s453_s6 = inlined_call_operand.vmem [shape: f32[1,128], index: 6, kind: input, shape index: {}]   ;;  %s454_s7 = inlined_call_operand.hbm [shape: f32[8,128], index: 7, kind: output, shape index: {}]  }
   0x1   :  { %13 = vsyncpa [#allocation6], 0 }
   0x2   :  { %14 = vsyncpa [#allocation9], 0  ;;  %s31_s26 = sshll.u32 %s448_s1, 4  ;;  %s32_s26 = int_to_ptr.hbm [resolvable:$true] %s31_s26 }
   0x3   :  { %15 = vsyncpa [#allocation4], 0  ;;  %s376_s27 = smov [#allocation5]   ;;  %s21_s8 = sshll.u32 %s447_s0, 4  ;;  %s22_s8 = int_to_ptr.hbm [resolvable:$true] %s21_s8 }
   0x4   :  { %s33_s28 = sshll.u32 %s376_s27, 4  ;;  %s377_s9 = smov 128   ;;  %s34_s28 = int_to_ptr.vmem [resolvable:$true] %s33_s28 }
   0x5   :  { %s378_s10 = smov 8   ;;  %s379_s11 = smov [#allocation2]  }
   0x6   :  { %39 = dma.hbm_to_vmem [thread:$0]  %s32_s26, 2048, %s34_s28, [#allocation6], %s377_s9, %s377_s9, %s378_s10  }
   0x7   :  { %s23_s12 = sshll.u32 %s379_s11, 4  ;;  %s46_s15 = sshll.u32 %s450_s3, 4  ;;  %s24_s12 = int_to_ptr.vmem [resolvable:$true] %s23_s12  ;;  %s47_s15 = int_to_ptr.hbm [resolvable:$true] %s46_s15 }
   0x8   :  { %26 = dma.hbm_to_vmem [thread:$0]  %s22_s8, 128, %s24_s12, [#allocation3]  }
   0x9   :  { %s61_s17 = sshll.u32 %s452_s5, 4  ;;  %s380_s18 = smov [#allocation7]   ;;  %s62_s17 = int_to_ptr.hbm [resolvable:$true] %s61_s17 }
   0xa   :  { %s48_s19 = sshll.u32 %s380_s18, 4  ;;  %s381_s0 = smov [#allocation8]   ;;  %s49_s19 = int_to_ptr.vmem [resolvable:$true] %s48_s19 }
   0xb   :  { %54 = dma.hbm_to_vmem [thread:$0]  %s47_s15, 2048, %s49_s19, [#allocation6], %s377_s9, %s377_s9, %s378_s10  }
   0xc   :  { %s63_s20 = sshll.u32 %s381_s0, 4  ;;  %s64_s20 = int_to_ptr.vmem [resolvable:$true] %s63_s20 }
   0xd   :  { %69 = dma.hbm_to_vmem [thread:$0]  %s62_s17, 2048, %s64_s20, [#allocation9], %s377_s9, %s377_s9, %s378_s10  }
   0xe   :  { %368 = dma.done.wait [#allocation3], 128  }
   0xf   :  { %369 = vsyncadd [#allocation3], 4294967168 }
  0x10   :  { %370 = dma.done.wait [#allocation6], 4096  }
  0x11   :  { %371 = vsyncadd [#allocation6], 4294963200 }
  0x12   :  { %372 = dma.done.wait [#allocation9], 2048  }
  0x13   :  { %373 = vsyncadd [#allocation9], 4294965248  ;;  %v104_v0 = vld [vmem:[#allocation5 + $0x78] sm:$0xff]  ;;  %v103_v1 = vld [vmem:[#allocation5 + $0x70] sm:$0xff]  ;;  %s382_s24 = smov [#allocation10]   ;;  %s226_s28 = sshll.u32 %s454_s7, 4  ;;  %s227_s28 = int_to_ptr.hbm [resolvable:$true] %s226_s28 }
  0x14   :  { %109 = vmatpush.msra.mxu0 %v104_v0  ;;  %v102_v2 = vld [vmem:[#allocation5 + $0x68] sm:$0xff]  ;;  %v101_v3 = vld [vmem:[#allocation5 + $0x60] sm:$0xff]  ;;  %v147_v4 = vld [vmem:[#allocation7 + $0x78] sm:$0xff]  ;;  %s224_s25 = sshll.u32 %s382_s24, 4  ;;  %s225_s25 = int_to_ptr.vmem [resolvable:$true] %s224_s25 }
  0x15   :  { %v100_v5 = vld [vmem:[#allocation5 + $0x58] sm:$0xff]  ;;  %152 = vmatpush.msra.mxu1 %v147_v4  ;;  %v146_v6 = vld [vmem:[#allocation7 + $0x70] sm:$0xff]  ;;  %v145_v7 = vld [vmem:[#allocation7 + $0x68] sm:$0xff] }
  0x16   :  { %110 = vmatpush.msra.mxu0 %v103_v1  ;;  %v99_v8 = vld [vmem:[#allocation5 + $0x50] sm:$0xff]  ;;  %v144_v9 = vld [vmem:[#allocation7 + $0x60] sm:$0xff]  ;;  %v98_v10 = vld [vmem:[#allocation5 + $0x48] sm:$0xff] }
  0x17   :  { %153 = vmatpush.msra.mxu1 %v146_v6  ;;  %v143_v11 = vld [vmem:[#allocation7 + $0x58] sm:$0xff]  ;;  %v97_v12 = vld [vmem:[#allocation5 + $0x40] sm:$0xff]  ;;  %v142_v13 = vld [vmem:[#allocation7 + $0x50] sm:$0xff] }
  0x18   :  { %111 = vmatpush.msra.mxu0 %v102_v2  ;;  %v96_v14 = vld [vmem:[#allocation5 + $0x38] sm:$0xff]  ;;  %v141_v15 = vld [vmem:[#allocation7 + $0x48] sm:$0xff]  ;;  %v95_v16 = vld [vmem:[#allocation5 + $0x30] sm:$0xff] }
  0x19   :  { %154 = vmatpush.msra.mxu1 %v145_v7  ;;  %v140_v17 = vld [vmem:[#allocation7 + $0x40] sm:$0xff]  ;;  %v94_v18 = vld [vmem:[#allocation5 + $0x28] sm:$0xff]  ;;  %v139_v19 = vld [vmem:[#allocation7 + $0x38] sm:$0xff] }
  0x1a   :  { %112 = vmatpush.msra.mxu0 %v101_v3  ;;  %v93_v20 = vld [vmem:[#allocation5 + $0x20] sm:$0xff]  ;;  %v138_v21 = vld [vmem:[#allocation7 + $0x30] sm:$0xff]  ;;  %v92_v22 = vld [vmem:[#allocation5 + $0x18] sm:$0xff] }
  0x1b   :  { %155 = vmatpush.msra.mxu1 %v144_v9  ;;  %v137_v23 = vld [vmem:[#allocation7 + $0x28] sm:$0xff]  ;;  %v91_v24 = vld [vmem:[#allocation5 + $0x10] sm:$0xff]  ;;  %v136_v25 = vld [vmem:[#allocation7 + $0x20] sm:$0xff] }
  0x1c   :  { %113 = vmatpush.msra.mxu0 %v100_v5  ;;  %v90_v26 = vld [vmem:[#allocation5 + $0x8] sm:$0xff]  ;;  %v135_v27 = vld [vmem:[#allocation7 + $0x18] sm:$0xff]  ;;  %v89_v28 = vld [vmem:[#allocation5] sm:$0xff] }
  0x1d   :  { %156 = vmatpush.msra.mxu1 %v143_v11  ;;  %v88_v29 = vld [vmem:[#allocation2] sm:$0xff]  ;;  %v134_v30 = vld [vmem:[#allocation7 + $0x10] sm:$0xff]  ;;  %v133_v31 = vld [vmem:[#allocation7 + $0x8] sm:$0xff] }
  0x1e   :  { %114 = vmatpush.msra.mxu0 %v99_v8  ;;  %v132_v32 = vld [vmem:[#allocation7] sm:$0xff]  ;;  %v190_v33 = vld [vmem:[#allocation8 + $0x78] sm:$0xff]  ;;  %v189_v34 = vld [vmem:[#allocation8 + $0x70] sm:$0xff] }
  0x1f   :  { %157 = vmatpush.msra.mxu1 %v142_v13  ;;  %195 = vmatpush.msra.mxu2 %v190_v33  ;;  %v188_v35 = vld [vmem:[#allocation8 + $0x68] sm:$0xff]  ;;  %v187_v36 = vld [vmem:[#allocation8 + $0x60] sm:$0xff]  ;;  %v186_v37 = vld [vmem:[#allocation8 + $0x58] sm:$0xff] }
  0x20   :  { %115 = vmatpush.msra.mxu0 %v98_v10  ;;  %v185_v38 = vld [vmem:[#allocation8 + $0x50] sm:$0xff]  ;;  %v184_v39 = vld [vmem:[#allocation8 + $0x48] sm:$0xff]  ;;  %v183_v40 = vld [vmem:[#allocation8 + $0x40] sm:$0xff] }
  0x21   :  { %158 = vmatpush.msra.mxu1 %v141_v15  ;;  %196 = vmatpush.msra.mxu2 %v189_v34  ;;  %v182_v41 = vld [vmem:[#allocation8 + $0x38] sm:$0xff]  ;;  %v181_v42 = vld [vmem:[#allocation8 + $0x30] sm:$0xff]  ;;  %v180_v43 = vld [vmem:[#allocation8 + $0x28] sm:$0xff] }
  0x22   :  { %116 = vmatpush.msra.mxu0 %v97_v12  ;;  %v179_v44 = vld [vmem:[#allocation8 + $0x20] sm:$0xff]  ;;  %v178_v45 = vld [vmem:[#allocation8 + $0x18] sm:$0xff]  ;;  %v177_v51 = vld [vmem:[#allocation8 + $0x10] sm:$0xff] }
  0x23   :  { %159 = vmatpush.msra.mxu1 %v140_v17  ;;  %197 = vmatpush.msra.mxu2 %v188_v35  ;;  %v245_v46 = vld [vmem:[%s449_s2] ss:$0 sm:$0xff]  ;;  %v176_v52 = vld [vmem:[#allocation8 + $0x8] sm:$0xff]  ;;  %v175_v53 = vld [vmem:[#allocation8] sm:$0xff] }
  0x24   :  { %117 = vmatpush.msra.mxu0 %v96_v14  ;;  %v246_v54 = vld [vmem:[%s451_s4] ss:$0 sm:$0xff] }
  0x25   :  { %160 = vmatpush.msra.mxu1 %v139_v19  ;;  %198 = vmatpush.msra.mxu2 %v187_v36  ;;  %v247_v59 = vld [vmem:[%s453_s6] ss:$0 sm:$0xff] }
  0x26   :  { %118 = vmatpush.msra.mxu0 %v95_v16 }
  0x27   :  { %161 = vmatpush.msra.mxu1 %v138_v21  ;;  %199 = vmatpush.msra.mxu2 %v186_v37 }
  0x28   :  { %119 = vmatpush.msra.mxu0 %v94_v18 }
  0x29   :  { %162 = vmatpush.msra.mxu1 %v137_v23  ;;  %200 = vmatpush.msra.mxu2 %v185_v38 }
  0x2a   :  { %120 = vmatpush.msra.mxu0 %v93_v20 }
  0x2b   :  { %163 = vmatpush.msra.mxu1 %v136_v25  ;;  %201 = vmatpush.msra.mxu2 %v184_v39 }
  0x2c   :  { %121 = vmatpush.msra.mxu0 %v92_v22 }
  0x2d   :  { %164 = vmatpush.msra.mxu1 %v135_v27  ;;  %202 = vmatpush.msra.mxu2 %v183_v40 }
  0x2e   :  { %122 = vmatpush.msra.mxu0 %v91_v24 }
  0x2f   :  { %165 = vmatpush.msra.mxu1 %v134_v30  ;;  %203 = vmatpush.msra.mxu2 %v182_v41 }
  0x30   :  { %123 = vmatpush.msra.mxu0 %v90_v26 }
  0x31   :  { %166 = vmatpush.msra.mxu1 %v133_v31  ;;  %204 = vmatpush.msra.mxu2 %v181_v42 }
  0x32   :  { %124 = vmatpush.msra.mxu0 %v89_v28 }
  0x33   :  { %125 = vmatmul.f32.vlgmr.msra.gmra.mxu0 %v88_v29  ;;  %167 = vmatpush.msra.mxu1 %v132_v32 }
  0x34   :  { %205 = vmatpush.msra.mxu2 %v180_v43 }
  0x36   :  { %206 = vmatpush.msra.mxu2 %v179_v44 }
  0x38   :  { %207 = vmatpush.msra.mxu2 %v178_v45 }
  0x3a   :  { %208 = vmatpush.msra.mxu2 %v177_v51 }
  0x3c   :  { %209 = vmatpush.msra.mxu2 %v176_v52 }
  0x3e   :  { %210 = vmatpush.msra.mxu2 %v175_v53 }
  0xb0   :  { %v126_v47 = vpop.f32.mrf.mxu0 }
  0xb1   :  { %v127_v48 = vadd.f32 %v245_v46, %v126_v47 }
  0xb3   :  { %vm129_vm0 = vcmp.gt.f32.partialorder %v127_v48, 0.0  ;;  %v130_v49 = vmul.f32 0.1, %v127_v48 }
  0xb5   :  { %v131_v50 = vsel %vm129_vm0, %v127_v48, %v130_v49 }
  0xb6   :  { %168 = vmatmul.f32.vlgmr.msra.gmra.mxu1 %v131_v50 }
 0x133   :  { %v169_v55 = vpop.f32.mrf.mxu1 }
 0x134   :  { %v170_v56 = vadd.f32 %v246_v54, %v169_v55 }
 0x136   :  { %vm172_vm1 = vcmp.gt.f32.partialorder %v170_v56, 0.0  ;;  %v173_v57 = vmul.f32 0.1, %v170_v56 }
 0x138   :  { %v174_v58 = vsel %vm172_vm1, %v170_v56, %v173_v57 }
 0x139   :  { %211 = vmatmul.f32.vlgmr.msra.gmra.mxu2 %v174_v58 }
 0x1bc   :  { %v212_v60 = vpop.f32.mrf.mxu2 }
 0x1bd   :  { %v213_v61 = vadd.f32 %v247_v59, %v212_v60 }
 0x1bf   :  { %vm215_vm2 = vcmp.gt.f32.partialorder %v213_v61, 0.0  ;;  %v216_v62 = vmul.f32 0.1, %v213_v61 }
 0x1c1   :  { %v217_v63 = vsel %vm215_vm2, %v213_v61, %v216_v62 }
 0x1c2   :  { %218 = vst [vmem:[#allocation10] sm:$0xff] %v217_v63 }
 0x1c3   :  { %229 = dma.vmem_to_hbm [thread:$0]  %s225_s25, 128, %s227_s28, [#allocation4]  }
 0x1c4   :  { %374 = dma.done.wait [#allocation4], 128  }
 0x1c5   :  { %375 = vsyncadd [#allocation4], 4294967168 }
 0x1c6   :  { %234 = vsyncpa [#allocation3], 1 }
 0x1c7   :  { %235 = vsyncpa [#allocation6], 1 }
 0x1c8   :  { %236 = vsyncpa [#allocation9], 1 }
 0x1c9   :  { %237 = vsyncpa [#allocation4], 1 }

</bundles_post_ra>
